<compile_context>
chip_gen: v6e
topology: v6e:2x2x1
jax: 0.10.0
libtpu: 0.0.40
codegen_flags: <defaults>
</compile_context>

<pallas_src>
import functools

import jax
import jax.numpy as jnp
from jax.experimental import pallas as pl
from jax.experimental.pallas import tpu as pltpu

_LANE = 128


def _round_up(n, m):
    return ((n + m - 1) // m) * m


def _sublane_tile(dtype):
    itemsize = jnp.dtype(dtype).itemsize
    if itemsize >= 4:
        return 8
    if itemsize == 2:
        return 16
    return 32


def _vmem_config():
    """Returns (per-block f32 working-set budget, scoped vmem_limit cap)."""
    try:
        info = pltpu.get_tpu_info()
        cap = getattr(info, "vmem_capacity_bytes", None)
        if cap is not None and cap >= 100 * 1024 * 1024:
            # v5e / v6e: 128 MiB VMEM -> bigger blocks, fewer grid steps.
            return 6 * 1024 * 1024, 64 * 1024 * 1024
    except Exception:
        pass
    # v7x (64 MiB per TC) or unknown: stay conservative.
    return 2 * 1024 * 1024, 48 * 1024 * 1024


def _layernorm_kernel(x_ref, w_ref, b_ref, o_ref, *, eps, affine):
    # x_ref: (bB, C, tT); w_ref / b_ref: (1, C, 1)
    x = x_ref[...]
    if x.dtype != jnp.float32:
        x = x.astype(jnp.float32)
    mu = jnp.mean(x, axis=1, keepdims=True)                 # (bB, 1, tT)
    res = x - mu
    sigma = jnp.mean(res * res, axis=1, keepdims=True)      # biased variance
    out = res * jax.lax.rsqrt(sigma + eps)
    if affine:
        out = out * w_ref[...].astype(jnp.float32)
        out = out + b_ref[...].astype(jnp.float32)
    o_ref[...] = out.astype(o_ref.dtype)


def layernorm_bct(x, weight=None, bias=None, *, eps=1e-5, affine=True):
    """LayerNorm over the channel dim of a (B, C, T) tensor (PyTorch semantics)."""
    assert x.ndim == 3
    B, C, T = x.shape
    itemsize = jnp.dtype(x.dtype).itemsize

    if not affine:
        # Dummy params (ignored in the kernel body when affine=False).
        weight = jnp.ones((1, C, 1), dtype=x.dtype)
        bias = jnp.zeros((1, C, 1), dtype=x.dtype)

    budget_f32, vmem_cap = _vmem_config()

    # --- tile selection (cdiv-based; last block along B / T may be partial,
    #     Pallas pads reads and masks stores for the single tail block).
    #     Budget in f32 working bytes with the sublane-padded channel count.
    C_pad = _round_up(C, _sublane_tile(x.dtype))
    col_bytes_f32 = C_pad * _LANE * 4            # one 128-lane column, one row

    n128_total = pl.cdiv(T, _LANE)               # total 128-lane columns
    max_n128 = max(1, budget_f32 // col_bytes_f32)
    n128 = min(n128_total, max_n128)
    tT = n128 * _LANE

    max_bB = max(1, budget_f32 // (C_pad * tT * 4))
    bB = min(B, max_bB)

    # Keep >= 2 grid steps when the tensor allows, so both v7x TCs get work.
    if pl.cdiv(B, bB) * pl.cdiv(n128_total, n128) < 2:
        if n128_total >= 2:
            n128 = pl.cdiv(n128_total, 2)
            tT = n128 * _LANE
        elif B >= 2:
            bB = pl.cdiv(B, 2)

    grid = (pl.cdiv(B, bB), pl.cdiv(T, tT))

    # VMEM estimate: double-buffered in + out (input dtype, sublane-padded)
    # plus ~4 block-sized f32 temps inside the body, with 1.5x headroom.
    block_bytes_in = bB * C_pad * tT * itemsize
    block_bytes_f32 = bB * C_pad * tT * 4
    needed = 4 * block_bytes_in + 4 * block_bytes_f32
    vmem_limit = int(min(max(32 * 1024 * 1024, needed * 3 // 2), vmem_cap))
    # TODO(synk): for extremely large C (single (1, C, 128) block > VMEM), a
    # two-pass C-split path would be needed; typical num_channels never hits it.

    kernel = functools.partial(_layernorm_kernel, eps=eps, affine=affine)

    x_spec = pl.BlockSpec((bB, C, tT), lambda b, t: (b, 0, t))
    wb_spec = pl.BlockSpec((1, C, 1), lambda b, t: (0, 0, 0))
    out_spec = pl.BlockSpec((bB, C, tT), lambda b, t: (b, 0, t))

    cost = pl.CostEstimate(
        flops=8 * B * C * T,
        transcendentals=B * T,
        bytes_accessed=2 * B * C * T * itemsize + 2 * C * itemsize,
    )

    out = pl.pallas_call(
        kernel,
        out_shape=jax.ShapeDtypeStruct((B, C, T), x.dtype),
        grid_spec=pltpu.PrefetchScalarGridSpec(
            num_scalar_prefetch=0,
            grid=grid,
            in_specs=[x_spec, wb_spec, wb_spec],
            out_specs=out_spec,
        ),
        compiler_params=pltpu.CompilerParams(
            # Both axes independent -> shards across the 2 TCs on v7x.
            dimension_semantics=("parallel", "parallel"),
            vmem_limit_bytes=vmem_limit,
        ),
        cost_estimate=cost,
    )(x, weight, bias)
    return out


def layernorm_ref(x, weight, bias, *, eps=1e-5, affine=True):
    mu = jnp.mean(x, axis=1, keepdims=True)
    res = x - mu
    sigma = jnp.mean(res * res, axis=1, keepdims=True)
    out = res / jnp.sqrt(sigma + eps)
    if affine:
        out = out * weight + bias
    return out


if __name__ == "__main__":
    B, C, T = 2, 4, 128
    key = jax.random.PRNGKey(0)
    kx, kw, kb, kx2, kx3 = jax.random.split(key, 5)

    x = jax.random.normal(kx, (B, C, T), dtype=jnp.float32)
    # Parameter shapes from LayerNorm.__init__: (1, C, 1). Default init is
    # ones/zeros; use deterministic random values to exercise the affine path.
    weight = 1.0 + 0.1 * jax.random.normal(kw, (1, C, 1), dtype=jnp.float32)
    bias = 0.1 * jax.random.normal(kb, (1, C, 1), dtype=jnp.float32)

    out = jax.block_until_ready(layernorm_bct(x, weight, bias, eps=1e-5, affine=True))
    ref = layernorm_ref(x, weight, bias, eps=1e-5, affine=True)
    assert out.shape == (B, C, T)
    assert jnp.allclose(out, ref, atol=1e-5, rtol=1e-5)

    # Non-128-multiple T exercises the ragged (masked) tail block path.
    T2 = 100
    x2 = jax.random.normal(kx2, (B, C, T2), dtype=jnp.float32)
    out2 = jax.block_until_ready(layernorm_bct(x2, weight, bias, eps=1e-5, affine=True))
    ref2 = layernorm_ref(x2, weight, bias, eps=1e-5, affine=True)
    assert out2.shape == (B, C, T2)
    assert jnp.allclose(out2, ref2, atol=1e-5, rtol=1e-5)

    # affine=False path.
    x3 = jax.random.normal(kx3, (B, C, T), dtype=jnp.float32)
    out3 = jax.block_until_ready(layernorm_bct(x3, eps=1e-5, affine=False))
    ref3 = layernorm_ref(x3, None, None, eps=1e-5, affine=False)
    assert jnp.allclose(out3, ref3, atol=1e-5, rtol=1e-5)

    print("KERNEL_OK")
</pallas_src>

<mosaic_0001>
module attributes {stable_mosaic.version = 11 : i64} {
  func.func @_layernorm_kernel(%arg0: i32, %arg1: i32, %arg2: memref<1x4x128xf32, #tpu.memory_space<vmem>>, %arg3: memref<1x4x1xf32, #tpu.memory_space<vmem>>, %arg4: memref<1x4x1xf32, #tpu.memory_space<vmem>>, %arg5: memref<1x4x128xf32, #tpu.memory_space<vmem>>) attributes {dimension_semantics = [#tpu.dimension_semantics<parallel>, #tpu.dimension_semantics<parallel>], iteration_bounds = array<i64: 2, 1>, scalar_prefetch = 0 : i64, scratch_operands = 0 : i64, tpu.core_type = #tpu.core_type<tc>, window_params = [{transform_indices = @transform_0, window_bounds = array<i64: 1, 4, 128>}, {pipeline_mode = #tpu.pipeline_mode<synchronous>, transform_indices = @transform_1, window_bounds = array<i64: 1, 4, 1>}, {pipeline_mode = #tpu.pipeline_mode<synchronous>, transform_indices = @transform_2, window_bounds = array<i64: 1, 4, 1>}, {transform_indices = @transform_3, window_bounds = array<i64: 1, 4, 128>}]} {
    %c0 = arith.constant 0 : index
    %c0_0 = arith.constant 0 : index
    %c0_1 = arith.constant 0 : index
    %0 = vector.load %arg2[%c0, %c0_0, %c0_1] : memref<1x4x128xf32, #tpu.memory_space<vmem>>, vector<1x4x128xf32>
    %cst = arith.constant dense<0.000000e+00> : vector<1x128xf32>
    %1 = vector.multi_reduction <add>, %0, %cst [1] : vector<1x4x128xf32> to vector<1x128xf32>
    %2 = vector.shape_cast %1 : vector<1x128xf32> to vector<1x1x128xf32>
    %cst_2 = arith.constant 4.000000e+00 : f32
    %3 = vector.broadcast %cst_2 : f32 to vector<1x1x128xf32>
    %4 = arith.divf %2, %3 : vector<1x1x128xf32>
    %5 = vector.broadcast %4 : vector<1x1x128xf32> to vector<1x4x128xf32>
    %6 = arith.subf %0, %5 : vector<1x4x128xf32>
    %7 = arith.mulf %6, %6 : vector<1x4x128xf32>
    %cst_3 = arith.constant dense<0.000000e+00> : vector<1x128xf32>
    %8 = vector.multi_reduction <add>, %7, %cst_3 [1] : vector<1x4x128xf32> to vector<1x128xf32>
    %9 = vector.shape_cast %8 : vector<1x128xf32> to vector<1x1x128xf32>
    %cst_4 = arith.constant 4.000000e+00 : f32
    %10 = vector.broadcast %cst_4 : f32 to vector<1x1x128xf32>
    %11 = arith.divf %9, %10 : vector<1x1x128xf32>
    %cst_5 = arith.constant 9.99999974E-6 : f32
    %12 = vector.broadcast %cst_5 : f32 to vector<1x1x128xf32>
    %13 = arith.addf %11, %12 : vector<1x1x128xf32>
    %14 = math.rsqrt %13 : vector<1x1x128xf32>
    %15 = vector.broadcast %14 : vector<1x1x128xf32> to vector<1x4x128xf32>
    %16 = arith.mulf %6, %15 : vector<1x4x128xf32>
    %c0_6 = arith.constant 0 : index
    %c0_7 = arith.constant 0 : index
    %c0_8 = arith.constant 0 : index
    %17 = vector.load %arg3[%c0_6, %c0_7, %c0_8] : memref<1x4x1xf32, #tpu.memory_space<vmem>>, vector<1x4x1xf32>
    %18 = vector.broadcast %17 : vector<1x4x1xf32> to vector<1x4x128xf32>
    %19 = arith.mulf %16, %18 : vector<1x4x128xf32>
    %c0_9 = arith.constant 0 : index
    %c0_10 = arith.constant 0 : index
    %c0_11 = arith.constant 0 : index
    %20 = vector.load %arg4[%c0_9, %c0_10, %c0_11] : memref<1x4x1xf32, #tpu.memory_space<vmem>>, vector<1x4x1xf32>
    %21 = vector.broadcast %20 : vector<1x4x1xf32> to vector<1x4x128xf32>
    %22 = arith.addf %19, %21 : vector<1x4x128xf32>
    %c0_12 = arith.constant 0 : index
    %c0_13 = arith.constant 0 : index
    %c0_14 = arith.constant 0 : index
    %23 = vector.load %arg5[%c0_12, %c0_13, %c0_14] : memref<1x4x128xf32, #tpu.memory_space<vmem>>, vector<1x4x128xf32>
    tpu.vector_store %arg5[%c0_12, %c0_13, %c0_14], %22 {strides = array<i32>} : memref<1x4x128xf32, #tpu.memory_space<vmem>>, vector<1x4x128xf32>,
    return
  }
  func.func @transform_0(%arg0: i32, %arg1: i32) -> (i32, i32, i32) {
    %c0_i32 = arith.constant 0 : i32
    %c0_i32_0 = arith.constant 0 : i32
    return %arg0, %c0_i32, %arg1 : i32, i32, i32
  }
  func.func @transform_1(%arg0: i32, %arg1: i32) -> (i32, i32, i32) {
    %c0_i32 = arith.constant 0 : i32
    %c0_i32_0 = arith.constant 0 : i32
    %c0_i32_1 = arith.constant 0 : i32
    %c0_i32_2 = arith.constant 0 : i32
    return %c0_i32, %c0_i32_0, %c0_i32_1 : i32, i32, i32
  }
  func.func @transform_2(%arg0: i32, %arg1: i32) -> (i32, i32, i32) {
    %c0_i32 = arith.constant 0 : i32
    %c0_i32_0 = arith.constant 0 : i32
    %c0_i32_1 = arith.constant 0 : i32
    %c0_i32_2 = arith.constant 0 : i32
    return %c0_i32, %c0_i32_0, %c0_i32_1 : i32, i32, i32
  }
  func.func @transform_3(%arg0: i32, %arg1: i32) -> (i32, i32, i32) {
    %c0_i32 = arith.constant 0 : i32
    %c0_i32_0 = arith.constant 0 : i32
    return %arg0, %c0_i32, %arg1 : i32, i32, i32
  }
}

</mosaic_0001>

<bundles_post_ra>
// kernel: tpu_custom_call.1
= control target key start
LH: loop header
LB: loop body
LE: loop exit
PB: predicated region body
PF: predicated region fallthrough
CT: control target
= control target key end

     0   :  { %8 = vsyncpa [#allocation3], 0  ;;  %s591_s0 = inlined_call_operand.vmem [shape: f32[2,4,128], index: 0, kind: input, shape index: {}]   ;;  %s592_s1 = inlined_call_operand.vmem [shape: f32[1,4,1], index: 1, kind: input, shape index: {}]   ;;  %s593_s2 = inlined_call_operand.vmem [shape: f32[1,4,1], index: 2, kind: input, shape index: {}]   ;;  %s594_s3 = inlined_call_operand.hbm [shape: f32[2,4,128], index: 3, kind: output, shape index: {}]  }
   0x1   :  { %10 = vsyncpa [#allocation3 + $0x1], 0  ;;  %s486_s12 = smov 0   ;;  %s488_s13 = smov 0  }
   0x2   :  { %s490_s14 = smov 0   ;;  %s492_s15 = smov 0  }
   0x3   :  { %s494_s16 = smov 0   ;;  %s496_s17 = smov 0  }
   0x4 LB: > { %s316_s18 = sadd.s32 4294967295, %s462_s17   ;;  %s317_s19 = sadd.s32 4294967294, %s462_s17   ;;  %s462_s17 = sphi %s496_s17, %s16_s17   ;;  %s458_s16 = sphi %s494_s16, %s601_s16   ;;  %s454_s15 = sphi %s492_s15, %s600_s15   ;;  %s450_s14 = sphi %s490_s14, %s599_s14   ;;  %s446_s13 = sphi %s488_s13, %s598_s13   ;;  %s442_s12 = sphi %s486_s12, %s597_s12  }
   0x5   : > { %s28_s20 = sadd.s32 1, %s458_s16  ;;  %s107_s21 = sadd.s32 1, %s450_s14 }
   0x6   : > { %p30_p0 = scmp.ge.s32.totalorder %s28_s20, 2  ;;  %p117_p1 = scmp.ne.s32.totalorder %s450_s14, %s446_s13 }
   0x7   : > { %p118_p2 = scmp.eq.s32.totalorder %s316_s18, 1  ;;  %p123_p3 = scmp.ne.s32.totalorder %s446_s13, %s442_s12 }
   0x8   : > { %s603_s20 = smov (%p30_p0, %s28_s20), 0  ;;  %p124_p5 = scmp.eq.s32.totalorder %s317_s19, 1 }
   0x9   : > { %p526_p4 = por %p118_p2, %p117_p1  ;;  %s102_s23 = ssub.s32 %s458_s16, %s603_s20 }
   0xa   : > { %p320_p6 = scmp.ge.s32.totalorder %s462_s17, 1  ;;  %p105_p7 = scmp.eq.s32.totalorder %s102_s23, 0 }
   0xb   : > { %p533_p8 = por %p124_p5, %p123_p3  ;;  %p158_p9 = scmp.lt.s32.totalorder %s462_s17, 3 }
   0xc   : > { %s539_s25 = scalar_select %p105_p7, %s450_s14, %s107_s21  }
   0xd   : > { %p159_p10 = pnand %p320_p6, %p158_p9 }
   0xe   : > { %p184_p11 = scmp.lt.s32.totalorder (!%p159_p10), %s454_s15, 1  ;;  %s181_s8 = sand.u32 (!%p159_p10), 1, %s446_s13  }
   0xf   : > { %162 = sbr.rel (%p159_p10) target bundleno = 165 (0xa5), region = 32  ;;  %s321_s9 = sshll.u32 (!%p159_p10), %s181_s8, 2 }
  0x10   : > { %s324_s10 = sshll.u32 (!%p159_p10), %s454_s15, 6  ;;  %s183_s11 = scalar_lea.vmem (!%p159_p10), [#allocation2], %s321_s9 }
  0x11   : > { %s245_s18 = sshll.u32 (!%p159_p10), %s183_s11, 4  ;;  %s243_s23 = scalar_lea.hbm (!%p159_p10), %s594_s3, %s324_s10  ;;  %s246_s18 = int_to_ptr.vmem [resolvable:$true] %s245_s18 }
  0x12   : > { %s231_s26 = scalar_lea.sflag (!%p159_p10), [#allocation3], %s181_s8  ;;  %s386_s27 = scalar_lea.vmem (!%p159_p10), %s246_s18, 64 }
  0x13   : > { %p387_p12 = scmp.ne.s32.totalorder (!%p159_p10), %s246_s18, %s386_s27  ;;  %s465_s28 = smov (!%p159_p10), [#allocation2]  }
  0x14   : > { %v215_v0 = vld [vmem:[%s592_s1] sm:$0xf]  ;;  %v464_v1 = vmov 0   ;;  %s185_s30 = scalar_select %p184_p11, %s454_s15, 1  ;;  %vm192_vm0 = vcmask 1043456  }
  0x15   : > { %383 = vset.pattern.permute.xlu0 %v464_v1  ;;  %v222_v2 = vld [vmem:[%s593_s2] sm:$0xf]  ;;  %p388_p13 = pnand %p387_p12, %p526_p4  ;;  %s390_s29 = sshll.u32 %s465_s28, 4  ;;  %s391_s29 = int_to_ptr.vmem [resolvable:$false] %s390_s29 }
  0x16   : > { %218 = vperm.xlu0 %383, %v215_v0   ;;  %s322_s4 = sshll.u32 %s185_s30, 2  ;;  %s392_s15 = scalar_lea.vmem %s391_s29, 128 }
  0x17   : > { %s190_s7 = scalar_lea.vmem %s591_s0, %s322_s4  ;;  %p389_p0 = pneg %p388_p13 }
  0x18   : > { %v191_v3 = vld [vmem:[%s190_s7] sm:$0xf]  ;;  %p393_p1 = scmp.lt.s32.totalorder %s246_s18, %s391_s29  ;;  %p394_p2 = scmp.lt.s32.totalorder %s392_s15, %s386_s27 }
  0x19   : > { %v193_v4 = vsel %vm192_vm0, %v191_v3, 0.0 }
  0x1a   : > { %225 = vperm.xlu0 %383, %v222_v2   ;;  %v194_v5 = vrot.slane %v193_v4, 4  ;;  %p395_p3 = por %p394_p2, %p393_p1 }
  0x1c   : > { %v195_v6 = vadd.f32 %v194_v5, %v193_v4  ;;  %p396_p5 = pnand %p395_p3, %p389_p0 }
  0x1e   : > { %v196_v7 = vrot.slane %v195_v6, 2 }
  0x20   : > { %v197_v8 = vadd.f32 %v196_v7, %v195_v6 }
  0x22   : > { %v198_v9 = vrot.slane %v197_v8, 1 }
  0x24   : > { %v199_v10 = vadd.f32 %v198_v9, %v197_v8 }
  0x26   : > { %v201_v11 = vmul.f32 0.25, %v199_v10 }
  0x28   : > { %v202_v12 = vsub.f32 %v191_v3, %v201_v11 }
  0x2a   : > { %v203_v13 = vmul.f32 %v202_v12, %v202_v12 }
  0x2c   : > { %v204_v14 = vsel %vm192_vm0, %v203_v13, 0.0 }
  0x2d   : > { %v205_v15 = vrot.slane %v204_v14, 4 }
  0x2f   : > { %v206_v16 = vadd.f32 %v205_v15, %v204_v14 }
  0x31   : > { %v207_v17 = vrot.slane %v206_v16, 2 }
  0x33   : > { %v208_v18 = vadd.f32 %v207_v17, %v206_v16 }
  0x35   : > { %v209_v19 = vrot.slane %v208_v18, 1 }
  0x37   : > { %v210_v20 = vadd.f32 %v209_v19, %v208_v18 }
  0x39   : > { %v211_v21 = vmul.f32 0.25, %v210_v20 }
  0x3b   : > { %v212_v22 = vadd.f32 1e-05, %v211_v21 }
  0x3d   : > { %384 = vrsqrt.f32 %v212_v22 }
  0x4a   : > { %v385_v23 = vpop.eup %384 }
  0x4b   : > { %v214_v24 = vmul.f32 %v385_v23, %v202_v12 }
  0x91   : > { %v219_v25 = vpop.permute.xlu0 %218 }
  0x92   : > { %v221_v26 = vmul.f32 %v219_v25, %v214_v24 }
  0x95   : > { %v226_v27 = vpop.permute.xlu0 %225 }
  0x96   : > { %v228_v28 = vadd.f32 %v226_v27, %v221_v26 }
  0x98   : > { %229 = vst [vmem:[%s183_s11] sm:$0xf] %v228_v28 }
  0x99   : > { %399 = shalt.err (!%p396_p5)
}
  0x9a   : > { %s400_s30 = scalar_lea.hbm %s243_s23, 64  ;;  %s404_s6 = scalar_lea.hbm %s594_s3, 128 }
  0x9b   : > { %p401_p6 = scmp.ne.s32.totalorder %s243_s23, %s400_s30  ;;  %p405_p10 = scmp.lt.s32.totalorder %s243_s23, %s594_s3 }
  0x9c   : > { %p406_p11 = scmp.lt.s32.totalorder %s404_s6, %s400_s30 }
  0x9d   : > { %p402_p7 = pnand %p401_p6, %p526_p4 }
  0x9e   : > { %p407_p12 = por %p406_p11, %p405_p10 }
  0x9f   : > { %p403_p9 = pneg %p402_p7 }
  0xa1   : > { %p408_p13 = pnand %p407_p12, %p403_p9 }
  0xa3   : > { %411 = shalt.err (!%p408_p13)
}
  0xa4   : > { %327 = dma.vmem_to_hbm [thread:$0]  (%p526_p4), %s246_s18, 64, %s243_s23, %s231_s26  }
  0xa5 PF: > { %p333_p0 = scmp.ge.s32.totalorder %s462_s17, 2  ;;  %s257_s9 = sand.u32 1, %s442_s12  }
  0xa6   : > { %s258_s10 = scalar_lea.sflag [#allocation3], %s257_s9 }
  0xa7   : > { %p330_p1 = pnand %p333_p0, %p533_p8 }
  0xa9   : > { %p331_p2 = pneg %p330_p1 }
  0xab   : > { %437 = dma.done.wait (%p331_p2), %s258_s10, 64  }
  0xac   : > { %439 = vsyncadd (%p331_p2), %s258_s10, 4294967232  ;;  %s16_s17 = sadd.s32 1, %s462_s17   ;;  %s597_s12 = smov %s446_s13 }
  0xad   : > { %p13_p3 = scmp.ge.s32.totalorder %s16_s17, 4   ;;  %s598_s13 = smov %s450_s14 }
  0xae   : > { %s599_s14 = smov %s539_s25  ;;  %s600_s15 = smov %s458_s16 }
  0xaf   : > { %s601_s16 = smov %s603_s20  ;;  %15 = sbr.rel (!%p13_p3) target bundleno = 4 (0x4), region = 67 }
  0xb4   :  { %263 = vsyncpa [#allocation3], 1 }
  0xb5   :  { %265 = vsyncpa [#allocation3 + $0x1], 1 }

</bundles_post_ra>
